<compile_context>
chip_gen: v7x
topology: tpu7x:2x2x1
jax: 0.10.0
libtpu: 0.0.40
codegen_flags: <defaults>
</compile_context>

<pallas_src>
import functools

import jax
import jax.numpy as jnp
from jax.experimental import pallas as pl
from jax.experimental.pallas import tpu as pltpu


def _head_kernel(*refs, scale, causal, dropout_scale, has_dropout, tq):
    """One (batch, q-tile) grid step of a single attention head.

    refs (in order):
      x_ref    : (1, T, C)       bf16, full sequence for this batch element
      w_ref    : (C, hs_pad)     bf16, shared key/query/value projection
      mask_ref : (1, tq, T)      bf16 0/1 keep-mask   [only if has_dropout]
      o_ref    : (1, tq, hs_pad) output rows for this query tile
      kv_ref   : (T, hs_pad)     bf16 VMEM scratch, persistent across q-tiles
    """
    if has_dropout:
        x_ref, w_ref, mask_ref, o_ref, kv_ref = refs
    else:
        x_ref, w_ref, o_ref, kv_ref = refs
        mask_ref = None

    T = x_ref.shape[1]

    # k = q = v = x @ W : computed once per batch element (q-tile index == 0),
    # cached in VMEM scratch and reused by every later q-tile.
    @pl.when(pl.program_id(1) == 0)
    def _():
        kv_ref[...] = jnp.dot(
            x_ref[0], w_ref[...], preferred_element_type=jnp.float32
        ).astype(jnp.bfloat16)

    if tq == T:
        q_start = 0
        q = kv_ref[...]
    else:
        q_start = pl.multiple_of(pl.program_id(1) * tq, tq)
        q = kv_ref[pl.ds(q_start, tq), :]          # aligned ref slice, no copy

    # Fold the C**-0.5 scale into q (tq x hs elements) instead of (tq, T) scores.
    q = (q.astype(jnp.float32) * scale).astype(jnp.bfloat16)
    k = kv_ref[...]                                # (T, hs_pad) bf16

    # scores = q @ k^T  (contract head dim; bf16 MXU inputs, f32 accumulate)
    scores = jax.lax.dot_general(
        q, k, (((1,), (1,)), ((), ())),
        preferred_element_type=jnp.float32)        # (tq, T) f32

    if causal:
        rows = jax.lax.broadcasted_iota(jnp.int32, scores.shape, 0) + q_start
        cols = jax.lax.broadcasted_iota(jnp.int32, scores.shape, 1)
        scores = jnp.where(cols <= rows, scores, -jnp.inf)

    # softmax over keys, f32, exact reciprocal (eval-mode accuracy).
    m = jnp.max(scores, axis=-1, keepdims=True)
    e = jnp.exp(scores - m)
    denom = jnp.sum(e, axis=-1, keepdims=True)
    attn = e / denom

    if has_dropout:
        # Inverted dropout on the attention weights with a precomputed 0/1 mask.
        keep = mask_ref[0].astype(jnp.float32)     # (tq, T)
        attn = attn * (keep * dropout_scale)

    out = jnp.dot(attn.astype(jnp.bfloat16), kv_ref[...],
                  preferred_element_type=jnp.float32)   # (tq, hs_pad)
    o_ref[0] = out.astype(o_ref.dtype)


def _pick_q_tile(T, cap=256):
    # Cap 256 suits v6e/v7x (256-wide MXU); pass tq=128 explicitly on v5e.
    if T <= cap:
        return T
    for cand in range(cap - cap % 8, 7, -8):
        if T % cand == 0:
            return cand
    return T


def head_forward(x, w_key, *, block_size, dropout_rate, is_encoder=False,
                 train=False, dropout_rng=None, tq=None):
    """x: (B, T, n_embed) f32, w_key: (n_embed, head_size). Returns (B, T, head_size)."""
    B, T, C = x.shape
    hs = w_key.shape[1]
    assert T <= block_size, "sequence length must not exceed block_size"
    if tq is None:
        tq = _pick_q_tile(T)
    assert T % tq == 0 and (tq == T or tq % 8 == 0)

    # Lane-dense head dimension: zero-pad hs up to a multiple of 128.
    hs_pad = ((hs + 127) // 128) * 128
    w_pad = w_key if hs_pad == hs else jnp.pad(w_key, ((0, 0), (0, hs_pad - hs)))

    # Pre-cast inputs to bf16 so the dominant x DMA is half the bytes.
    x_bf = x.astype(jnp.bfloat16)
    w_bf = w_pad.astype(jnp.bfloat16)

    scale = float(C) ** -0.5
    p = float(dropout_rate)
    has_dropout = bool(train) and p > 0.0
    dropout_scale = 1.0 / (1.0 - p) if p < 1.0 else 0.0

    inputs = [x_bf, w_bf]
    in_specs = [
        # full sequence for this batch element (k/v need all rows); the index
        # map ignores the q-tile axis so Pallas does not re-DMA it per tile.
        pl.BlockSpec((1, T, C), lambda b, i: (b, 0, 0)),
        # projection weights, resident across the whole grid
        pl.BlockSpec((C, hs_pad), lambda b, i: (0, 0)),
    ]
    if has_dropout:
        if dropout_rng is None:
            dropout_rng = jax.random.PRNGKey(0)
        keep = jax.random.bernoulli(dropout_rng, 1.0 - p, (B, T, T))
        inputs.append(keep.astype(jnp.bfloat16))
        in_specs.append(pl.BlockSpec((1, tq, T), lambda b, i: (b, i, 0)))

    kernel = functools.partial(
        _head_kernel, scale=scale, causal=not is_encoder,
        dropout_scale=dropout_scale, has_dropout=has_dropout, tq=tq)

    # VMEM budget estimate (double-buffered blocks + scratch + f32 intermediates),
    # capped at 32 MiB to leave headroom on v7x's 64 MiB VMEM.
    out_itemsize = jnp.dtype(x.dtype).itemsize
    est = (2 * T * C * 2                  # x block (bf16, double-buffered)
           + 2 * C * hs_pad * 2           # weight block
           + T * hs_pad * 2               # kv scratch
           + 2 * tq * hs_pad * out_itemsize
           + (2 * tq * T * 2 if has_dropout else 0)
           + 4 * tq * T * 4)              # f32 scores / exp / attn headroom
    vmem_limit = int(min(max(2 * est, 16 * 2 ** 20), 32 * 2 ** 20))

    out = pl.pallas_call(
        kernel,
        out_shape=jax.ShapeDtypeStruct((B, T, hs_pad), x.dtype),
        grid_spec=pltpu.PrefetchScalarGridSpec(
            num_scalar_prefetch=0,
            grid=(B, T // tq),
            in_specs=in_specs,
            out_specs=pl.BlockSpec((1, tq, hs_pad), lambda b, i: (b, i, 0)),
            scratch_shapes=[pltpu.VMEM((T, hs_pad), jnp.bfloat16)],
        ),
        compiler_params=pltpu.CompilerParams(
            # batch axis parallel (megacore); q-tile axis must be arbitrary
            # because the kv scratch is reused across it.
            dimension_semantics=("parallel", "arbitrary"),
            vmem_limit_bytes=vmem_limit),
    )(*inputs)

    if hs_pad != hs:
        out = out[..., :hs]
    return out


def head_reference(x, w_key, *, is_encoder=False, keep_mask=None, dropout_rate=0.0):
    """Plain-JAX reference mirroring the PyTorch forward."""
    B, T, C = x.shape
    k = jnp.einsum("btc,ch->bth", x, w_key, precision="highest")
    q = k
    v = k
    scores = jnp.einsum("btd,bsd->bts", q, k, precision="highest") * (C ** -0.5)
    if not is_encoder:
        mask = jnp.tril(jnp.ones((T, T), dtype=bool))
        scores = jnp.where(mask[None], scores, -jnp.inf)
    attn = jax.nn.softmax(scores, axis=-1)
    if keep_mask is not None:
        attn = attn * keep_mask.astype(attn.dtype) / (1.0 - dropout_rate)
    return jnp.einsum("bts,bsh->bth", attn, v, precision="highest")


if __name__ == "__main__":
    n_embed, head_size, block_size = 32, 16, 8
    dropout_rate = 0.1
    B, T = 2, 8

    key = jax.random.PRNGKey(0)
    wkey, xkey = jax.random.split(key)
    bound = 1.0 / (n_embed ** 0.5)            # nn.Linear default init range
    w_key = jax.random.uniform(wkey, (n_embed, head_size), jnp.float32, -bound, bound)
    x = jax.random.normal(xkey, (B, T, n_embed), dtype=jnp.float32)

    # Eval mode, causal (decoder) head — verify against plain-JAX reference.
    y = head_forward(x, w_key, block_size=block_size, dropout_rate=dropout_rate,
                     is_encoder=False, train=False)
    jax.block_until_ready(y)
    y_ref = head_reference(x, w_key, is_encoder=False)
    assert y.shape == (B, T, head_size)
    assert jnp.allclose(y, y_ref, atol=3e-2, rtol=3e-2), \
        float(jnp.max(jnp.abs(y - y_ref)))

    # Eval mode, encoder head (no causal mask).
    y_enc = head_forward(x, w_key, block_size=block_size, dropout_rate=dropout_rate,
                         is_encoder=True, train=False)
    jax.block_until_ready(y_enc)
    y_enc_ref = head_reference(x, w_key, is_encoder=True)
    assert jnp.allclose(y_enc, y_enc_ref, atol=3e-2, rtol=3e-2)

    # Training mode: dropout on attention weights, mask streamed into the kernel.
    drop_rng = jax.random.PRNGKey(42)
    y_tr = head_forward(x, w_key, block_size=block_size, dropout_rate=dropout_rate,
                        is_encoder=False, train=True, dropout_rng=drop_rng)
    jax.block_until_ready(y_tr)
    keep = jax.random.bernoulli(drop_rng, 1.0 - dropout_rate, (B, T, T))
    y_tr_ref = head_reference(x, w_key, is_encoder=False, keep_mask=keep,
                              dropout_rate=dropout_rate)
    assert y_tr.shape == (B, T, head_size)
    assert bool(jnp.all(jnp.isfinite(y_tr)))
    assert jnp.allclose(y_tr, y_tr_ref, atol=3e-2, rtol=3e-2)

    print("KERNEL_OK")
</pallas_src>

<mosaic_0001>
module attributes {stable_mosaic.version = 11 : i64} {
  func.func @_head_kernel(%arg0: i32, %arg1: i32, %arg2: memref<1x8x32xbf16, #tpu.memory_space<vmem>>, %arg3: memref<32x128xbf16, #tpu.memory_space<vmem>>, %arg4: memref<1x8x128xf32, #tpu.memory_space<vmem>>, %arg5: memref<8x128xbf16, #tpu.memory_space<vmem>>) attributes {dimension_semantics = [#tpu.dimension_semantics<parallel>, #tpu.dimension_semantics<arbitrary>], iteration_bounds = array<i64: 2, 1>, scalar_prefetch = 0 : i64, scratch_operands = 1 : i64, tpu.core_type = #tpu.core_type<tc>, window_params = [{transform_indices = @transform_0, window_bounds = array<i64: 1, 8, 32>}, {pipeline_mode = #tpu.pipeline_mode<synchronous>, transform_indices = @transform_1, window_bounds = array<i64: 32, 128>}, {transform_indices = @transform_2, window_bounds = array<i64: 1, 8, 128>}]} {
    %c0_i32 = arith.constant 0 : i32
    %0 = arith.cmpi eq, %arg1, %c0_i32 : i32
    %1 = arith.extui %0 : i1 to i32
    %c0_i32_0 = arith.constant 0 : i32
    %2 = arith.cmpi ne, %1, %c0_i32_0 : i32
    scf.if %2 {
      %c0_15 = arith.constant 0 : index
      %c0_16 = arith.constant 0 : index
      %c0_17 = arith.constant 0 : index
      %32 = vector.load %arg2[%c0_15, %c0_16, %c0_17] : memref<1x8x32xbf16, #tpu.memory_space<vmem>>, vector<1x8x32xbf16>
      %33 = vector.shape_cast %32 : vector<1x8x32xbf16> to vector<8x32xbf16>
      %c0_18 = arith.constant 0 : index
      %c0_19 = arith.constant 0 : index
      %34 = vector.load %arg3[%c0_18, %c0_19] : memref<32x128xbf16, #tpu.memory_space<vmem>>, vector<32x128xbf16>
      %cst_20 = arith.constant dense<0.000000e+00> : vector<8x128xf32>
      %35 = tpu.matmul %33, %34, %cst_20 {dimension_numbers = #tpu.dot_dimension_numbers<[1], [0], [0], [1], [0, 0, 1, 1], [], []>} : vector<8x32xbf16>, vector<32x128xbf16>, vector<8x128xf32> -> vector<8x128xf32>
      %36 = arith.truncf %35 : vector<8x128xf32> to vector<8x128xbf16>
      %c0_21 = arith.constant 0 : index
      %c0_22 = arith.constant 0 : index
      %37 = vector.load %arg5[%c0_21, %c0_22] : memref<8x128xbf16, #tpu.memory_space<vmem>>, vector<8x128xbf16>
      tpu.vector_store %arg5[%c0_21, %c0_22], %36 {strides = array<i32>} : memref<8x128xbf16, #tpu.memory_space<vmem>>, vector<8x128xbf16>,
    } else {
    }
    %c0 = arith.constant 0 : index
    %c0_1 = arith.constant 0 : index
    %3 = vector.load %arg5[%c0, %c0_1] : memref<8x128xbf16, #tpu.memory_space<vmem>>, vector<8x128xbf16>
    %4 = arith.extf %3 : vector<8x128xbf16> to vector<8x128xf32>
    %cst = arith.constant 0.176776692 : f32
    %5 = vector.broadcast %cst : f32 to vector<8x128xf32>
    %6 = arith.mulf %4, %5 : vector<8x128xf32>
    %7 = arith.truncf %6 : vector<8x128xf32> to vector<8x128xbf16>
    %c0_2 = arith.constant 0 : index
    %c0_3 = arith.constant 0 : index
    %8 = vector.load %arg5[%c0_2, %c0_3] : memref<8x128xbf16, #tpu.memory_space<vmem>>, vector<8x128xbf16>
    %cst_4 = arith.constant dense<0.000000e+00> : vector<8x8xf32>
    %9 = tpu.matmul %7, %8, %cst_4 {dimension_numbers = #tpu.dot_dimension_numbers<[1], [1], [0], [0], [0, 0, 1, 0], [], []>} : vector<8x128xbf16>, vector<8x128xbf16>, vector<8x8xf32> -> vector<8x8xf32>
    %10 = tpu.iota {dimensions = array<i32: 0>} : vector<8x8xi32>
    %c0_i32_5 = arith.constant 0 : i32
    %11 = vector.broadcast %c0_i32_5 : i32 to vector<8x8xi32>
    %12 = arith.addi %10, %11 : vector<8x8xi32>
    %13 = tpu.iota {dimensions = array<i32: 1>} : vector<8x8xi32>
    %14 = arith.cmpi sle, %13, %12 : vector<8x8xi32>
    %cst_6 = arith.constant 0xFF800000 : f32
    %15 = vector.broadcast %cst_6 : f32 to vector<8x8xf32>
    %16 = arith.select %14, %9, %15 : vector<8x8xi1>, vector<8x8xf32>
    %cst_7 = arith.constant dense<0xFF800000> : vector<8xf32>
    %17 = vector.multi_reduction <maximumf>, %16, %cst_7 [1] : vector<8x8xf32> to vector<8xf32>
    %18 = vector.shape_cast %17 : vector<8xf32> to vector<8x1xf32>
    %19 = vector.broadcast %18 : vector<8x1xf32> to vector<8x8xf32>
    %20 = arith.subf %16, %19 : vector<8x8xf32>
    %21 = math.exp %20 : vector<8x8xf32>
    %cst_8 = arith.constant dense<0.000000e+00> : vector<8xf32>
    %22 = vector.multi_reduction <add>, %21, %cst_8 [1] : vector<8x8xf32> to vector<8xf32>
    %23 = vector.shape_cast %22 : vector<8xf32> to vector<8x1xf32>
    %24 = vector.broadcast %23 : vector<8x1xf32> to vector<8x8xf32>
    %25 = arith.divf %21, %24 : vector<8x8xf32>
    %26 = arith.truncf %25 : vector<8x8xf32> to vector<8x8xbf16>
    %c0_9 = arith.constant 0 : index
    %c0_10 = arith.constant 0 : index
    %27 = vector.load %arg5[%c0_9, %c0_10] : memref<8x128xbf16, #tpu.memory_space<vmem>>, vector<8x128xbf16>
    %cst_11 = arith.constant dense<0.000000e+00> : vector<8x128xf32>
    %28 = tpu.matmul %26, %27, %cst_11 {dimension_numbers = #tpu.dot_dimension_numbers<[1], [0], [0], [1], [0, 0, 1, 1], [], []>} : vector<8x8xbf16>, vector<8x128xbf16>, vector<8x128xf32> -> vector<8x128xf32>
    %c0_12 = arith.constant 0 : index
    %c0_13 = arith.constant 0 : index
    %c0_14 = arith.constant 0 : index
    %29 = vector.load %arg4[%c0_12, %c0_13, %c0_14] : memref<1x8x128xf32, #tpu.memory_space<vmem>>, vector<1x8x128xf32>
    %30 = vector.shape_cast %29 : vector<1x8x128xf32> to vector<8x128xf32>
    %31 = vector.shape_cast %28 : vector<8x128xf32> to vector<1x8x128xf32>
    tpu.vector_store %arg4[%c0_12, %c0_13, %c0_14], %31 {strides = array<i32>} : memref<1x8x128xf32, #tpu.memory_space<vmem>>, vector<1x8x128xf32>,
    return
  }
  func.func @transform_0(%arg0: i32, %arg1: i32) -> (i32, i32, i32) {
    %c0_i32 = arith.constant 0 : i32
    %c0_i32_0 = arith.constant 0 : i32
    %c0_i32_1 = arith.constant 0 : i32
    return %arg0, %c0_i32, %c0_i32_0 : i32, i32, i32
  }
  func.func @transform_1(%arg0: i32, %arg1: i32) -> (i32, i32) {
    %c0_i32 = arith.constant 0 : i32
    %c0_i32_0 = arith.constant 0 : i32
    %c0_i32_1 = arith.constant 0 : i32
    return %c0_i32, %c0_i32_0 : i32, i32
  }
  func.func @transform_2(%arg0: i32, %arg1: i32) -> (i32, i32, i32) {
    %c0_i32 = arith.constant 0 : i32
    %c0_i32_0 = arith.constant 0 : i32
    return %arg0, %arg1, %c0_i32 : i32, i32, i32
  }
}

</mosaic_0001>

<bundles_post_ra>
// kernel: tpu_custom_call.1
= control target key start
LH: loop header
LB: loop body
LE: loop exit
PB: predicated region body
PF: predicated region fallthrough
CT: control target
= control target key end

     0   :  { %7 = vsyncpa [#allocation4], 0  ;;  %s986_s0 = inlined_call_operand.hbm [shape: bf16[2,8,32], index: 0, kind: input, shape index: {}]   ;;  %s987_s1 = inlined_call_operand.hbm [shape: bf16[32,128], index: 1, kind: input, shape index: {}]   ;;  %s988_s2 = inlined_call_operand.hbm [shape: f32[2,8,128], index: 2, kind: output, shape index: {}]  }
   0x1   :  { %9 = vsyncpa [#allocation4 + $0x1], 0 }
   0x2   :  { %10 = vsyncpa [#allocation7], 0 }
   0x3   :  { %11 = vsyncpa [#allocation5], 0 }
   0x4   :  { %13 = vsyncpa [#allocation5 + $0x1], 0  ;;  %s768_s9 = smov 0   ;;  %s770_s10 = smov 0  }
   0x5   :  { %s772_s11 = smov 0   ;;  %s774_s12 = smov 0  }
   0x6   :  { %s776_s13 = smov 0   ;;  %s778_s14 = smov 0  }
   0x7 LB: > { %s471_s15 = sadd.s32 4294967295, %s744_s14   ;;  %s472_s16 = sadd.s32 4294967294, %s744_s14   ;;  %s744_s14 = sphi %s778_s14, %s19_s14   ;;  %s740_s13 = sphi %s776_s13, %s1012_s13   ;;  %s736_s12 = sphi %s774_s12, %s1011_s12   ;;  %s732_s11 = sphi %s772_s11, %s1010_s11   ;;  %s728_s10 = sphi %s770_s10, %s1009_s10   ;;  %s724_s9 = sphi %s768_s9, %s1008_s9  }
   0x8   : > { %p51_p0 = scmp.ne.s32.totalorder %s728_s10, %s724_s9  ;;  %p802_p1 = scmp.eq.s32.totalorder %s471_s15, 0 }
   0x9   : > { %p806_p2 = scmp.eq.s32.totalorder %s471_s15, 1  ;;  %p104_p3 = scmp.eq.s32.totalorder %s472_s16, 1 }
   0xa   : > { %s993_s17 = scalar_select %p802_p1, 1, 0 }
   0xb   : > { %s994_s18 = scalar_select %p806_p2, 1, 0 }
   0xc   : > { %p812_p4 = por %p802_p1, %p51_p0  ;;  %p473_p5 = scmp.ge.s32.totalorder %s744_s14, 1 }
   0xd   : > { %p817_p6 = por %p104_p3, %p51_p0  ;;  %p111_p7 = scmp.lt.s32.totalorder %s744_s14, 3 }
   0xe   : > { %s995_s19 = scalar_select %p812_p4, 1, 0 }
   0xf   : > { %s996_s20 = scalar_select %p817_p6, 1, 0 }
  0x10   : > { %p822_p8 = pnand %p473_p5, %p111_p7  ;;  %s746_s22 = smov [#allocation6]  }
  0x11   : > { %s123_s23 = sshll.u32 %s746_s22, 4  ;;  %s31_s25 = sadd.s32 1, %s740_s13  ;;  %s124_s23 = int_to_ptr.vmem [resolvable:$true] %s123_s23 }
  0x12   : > { %s997_s21 = scalar_select %p822_p8, 1, 0 }
  0x13   : > { %p525_p9 = pneg %p822_p8  ;;  %s600_s28 = scalar_lea.hbm %s987_s1, 256 }
  0x14   : > { %p601_p12 = scmp.ne.s32.totalorder %s987_s1, %s600_s28  ;;  %p607_p5 = scmp.lt.u32.totalorder %s600_s28, %s987_s1 }
  0x15   : > { %p831_p11 = pnand %p525_p9, %p802_p1 }
  0x17   : > { %p602_p13 = pneg %p831_p11 }
  0x19   : > { %p603_p0 = pnand %p602_p13, %p601_p12 }
  0x1b   : > { %p604_p3 = pneg %p603_p0 }
  0x1d   : > { %p609_p7 = pnand %p607_p5, %p604_p3 }
  0x1f   : > { %612 = shalt.err (!%p609_p7)
}
  0x20   : > { %s613_s5 = scalar_lea.vmem %s124_s23, 256  ;;  %p621_p1 = scmp.lt.s32.totalorder %s124_s23, %s124_s23 }
  0x21   : > { %p614_p9 = scmp.ne.s32.totalorder %s124_s23, %s613_s5  ;;  %p622_p4 = scmp.lt.s32.totalorder %s613_s5, %s613_s5 }
  0x23   : > { %p616_p10 = pnand %p614_p9, %p602_p13  ;;  %p623_p8 = por %p622_p4, %p621_p1 }
  0x25   : > { %p617_p6 = pneg %p616_p10 }
  0x27   : > { %p624_p2 = pnand %p623_p8, %p617_p6 }
  0x29   : > { %627 = shalt.err (!%p624_p2)
}
  0x2a   : > { %s747_s6 = smov 64   ;;  %s748_s7 = smov 4  }
  0x2b   : > { %528 = dma.hbm_to_vmem [thread:$0]  (!%p831_p11), %s987_s1, 256, %s124_s23, [#allocation7], %s747_s6, %s747_s6, %s748_s7  }
  0x2c   : > { %p33_p1 = scmp.ge.s32.totalorder %s31_s25, 2  ;;  %s38_s16 = sadd.s32 1, %s732_s11 }
  0x2d   : > { %p45_p2 = scmp.ne.s32.totalorder %s732_s11, %s728_s10  ;;  %p46_p4 = scmp.eq.s32.totalorder %s744_s14, 0 }
  0x2e   : > { %s1014_s25 = smov (%p33_p1, %s31_s25), 0  ;;  %p1000_p8 = scmp.ne.s32.totalorder %s994_s18, 0 }
  0x2f   : > { %p858_p6 = por %p46_p4, %p45_p2  ;;  %s35_s24 = ssub.s32 %s740_s13, %s1014_s25 }
  0x30   : > { %p864_p10 = por %p1000_p8, %p45_p2  ;;  %p538_p12 = scmp.lt.s32.totalorder %s744_s14, 2 }
  0x31   : > { %p36_p11 = scmp.eq.s32.totalorder %s35_s24, 0  ;;  %s137_s23 = sand.u32 1, %s732_s11  }
  0x32   : > { %s476_s27 = sshll.u32 %s137_s23, 2  ;;  %s477_s29 = sshll.u32 %s740_s13, 6 }
  0x33   : > { %s873_s28 = scalar_select %p36_p11, %s732_s11, %s38_s16  }
  0x34   : > { %s879_s4 = scalar_lea.hbm %s986_s0, %s477_s29  ;;  %s141_s18 = scalar_lea.vmem [#allocation3], %s476_s27 }
  0x35   : > { %s148_s5 = sshll.u32 %s141_s18, 4  ;;  %p885_p13 = pnand %p538_p12, %p858_p6  ;;  %s881_s5 = int_to_ptr.vmem [resolvable:$true] %s148_s5 }
  0x36   : > { %s138_s7 = scalar_lea.sflag [#allocation4], %s137_s23  ;;  %s628_s8 = scalar_lea.hbm %s879_s4, 64 }
  0x37   : > { %p629_p0 = scmp.ne.s32.totalorder %s879_s4, %s628_s8  ;;  %p630_p3 = pneg %p885_p13 }
  0x38   : > { %s633_s24 = scalar_lea.hbm %s986_s0, 128  ;;  %p634_p9 = scmp.lt.u32.totalorder %s879_s4, %s986_s0 }
  0x39   : > { %p631_p5 = pnand %p630_p3, %p629_p0  ;;  %p635_p1 = scmp.lt.u32.totalorder %s633_s24, %s628_s8 }
  0x3a   : > { %p637_p4 = scmp.lt.u32.totalorder %s628_s8, %s879_s4 }
  0x3b   : > { %p632_p7 = pneg %p631_p5  ;;  %p636_p2 = por %p635_p1, %p634_p9 }
  0x3d   : > { %p638_p6 = por %p637_p4, %p636_p2 }
  0x3f   : > { %p639_p8 = pnand %p638_p6, %p632_p7 }
  0x41   : > { %642 = shalt.err (!%p639_p8)
}
  0x42   : > { %s643_s23 = scalar_lea.vmem %s881_s5, 64  ;;  %s749_s29 = smov [#allocation3]  }
  0x43   : > { %p644_p12 = scmp.ne.s32.totalorder %s881_s5, %s643_s23  ;;  %s648_s30 = sshll.u32 %s749_s29, 4  ;;  %s649_s30 = int_to_ptr.vmem [resolvable:$false] %s648_s30 }
  0x44   : > { %s650_s3 = scalar_lea.vmem %s649_s30, 128  ;;  %p651_p5 = scmp.lt.s32.totalorder %s881_s5, %s649_s30 }
  0x45   : > { %p646_p11 = pnand %p644_p12, %p630_p3  ;;  %p652_p9 = scmp.lt.s32.totalorder %s650_s3, %s643_s23 }
  0x47   : > { %p647_p0 = pneg %p646_p11  ;;  %p653_p1 = por %p652_p9, %p651_p5 }
  0x49   : > { %p654_p2 = pnand %p653_p1, %p647_p0 }
  0x4b   : > { %657 = shalt.err (!%p654_p2)
}
  0x4c   : > { %532 = dma.hbm_to_vmem [thread:$0]  (!%p885_p13), %s879_s4, 64, %s881_s5, %s138_s7  }
  0x4d   : > { %p1003_p7 = scmp.ne.s32.totalorder %s997_s21, 0 }
  0x4e   : > { %s917_s18 = sand.u32 (!%p1003_p7), 1, %s728_s10   ;;  %p1004_p3 = scmp.ne.s32.totalorder (!%p1003_p7), %s995_s19, 0 }
  0x4f   : > { %157 = sbr.rel (%p1003_p7) target bundleno = 1085 (0x43d), region = 28  ;;  %s479_s8 = sshll.u32 (!%p1003_p7), %s917_s18, 2 }
  0x50   : > { %s160_s15 = scalar_lea.sflag (!%p1003_p7), [#allocation4], %s917_s18  ;;  %s163_s16 = scalar_lea.vmem (!%p1003_p7), [#allocation3], %s479_s8 }
  0x56   : > { %711 = dma.done.wait (%p1004_p3), %s160_s15, 64  }
  0x57   : > { %713 = vsyncadd (%p1004_p3), %s160_s15, 4294967232  ;;  %p1005_p4 = scmp.ne.s32.totalorder %s993_s17, 0 }
  0x59   : > { %715 = dma.done.wait (%p1005_p4), [#allocation7], 256  }
  0x5a   : > { %717 = vsyncadd (%p1005_p4), [#allocation7], 4294967040  ;;  %v750_v0 = vmov 0.0   ;;  %vm751_vm0 = vmmov 0   ;;  %v594_v1 = vld [vmem:[#allocation6] sm:$0xff]   ;;  %v595_v2 = vld [vmem:[#allocation6 + $0x8] sm:$0xff]   ;;  %v300_v14 = vlaneseq }
  0x5b   : > { %497 = vmatprep.subr.bf16.mxu0 %v750_v0  ;;  %501 = vmatprep.mubr.msk.bf16.mxu0 %vm751_vm0, %v750_v0  ;;  %v193_v3 = vld [vmem:[%s163_s16] sm:$0xf]  ;;  %vm210_vm1 = vcmask 261120   ;;  %vm322_vm2 = vcmask 1043456   ;;  %vm306_vm4 = vcmask 64512   ;;  %s481_s17 = sshll.u32 %s917_s18, 3 }
  0x5c   : > { %505 = vmatprep.subr.bf16.mxu1 %v750_v0  ;;  %507 = vmatprep.mubr.msk.bf16.mxu1 %vm751_vm0, %v750_v0  ;;  %v301_v15 = vshrl.u32 %v300_v14, 7  ;;  %v303_v16 = vand.u32 127, %v300_v14  ;;  %s187_s19 = scalar_lea.vmem [#allocation8], %s481_s17  ;;  %s487_s4 = sshll.u32 %s736_s12, 7 }
  0x5d   : > { %498 = vmatpush3.bf16.msra.mxu0 %v594_v1  ;;  %s382_s21 = sshll.u32 %s187_s19, 4  ;;  %s939_s7 = scalar_lea.hbm %s988_s2, %s487_s4  ;;  %s934_s21 = int_to_ptr.vmem [resolvable:$true] %s382_s21 }
  0x5e   : > { %499 = vmatprep.subr.bf16.mxu0 %v750_v0  ;;  %vm304_vm3 = vcmp.le.s32.totalorder %v303_v16, %v301_v15  ;;  %s368_s24 = scalar_lea.sflag [#allocation5], %s917_s18  ;;  %s658_s22 = scalar_lea.vmem %s934_s21, 128 }
  0x5f   : > { %p659_p13 = scmp.ne.s32.totalorder %s934_s21, %s658_s22  ;;  %s752_s12 = smov [#allocation8]  }
  0x60   : > { %s662_s27 = sshll.u32 %s752_s12, 4  ;;  %s663_s27 = int_to_ptr.vmem [resolvable:$false] %s662_s27 }
  0x61   : > { %500 = vmatpush3.bf16.msra.mxu0 %v595_v2  ;;  %p660_p6 = pnand %p659_p13, %p864_p10  ;;  %s664_s23 = scalar_lea.vmem %s663_s27, 256 }
  0x62   : > { %511 = vmatprep.subr.bf16.mxu0 %v750_v0  ;;  %p665_p12 = scmp.lt.s32.totalorder %s934_s21, %s663_s27  ;;  %p666_p11 = scmp.lt.s32.totalorder %s664_s23, %s658_s22 }
  0x63   : > { %p661_p8 = pneg %p660_p6 }
  0x64   : > { %502 = vmatmul.mubr.msk.bf16.vlgmr.msra.gmra.mrb[0].mxu0 %vm210_vm1, %v193_v3  ;;  %p667_p0 = por %p666_p11, %p665_p12 }
  0x65   : > { %513 = vmatprep.mubr.msk.bf16.mxu0 %vm751_vm0, %v750_v0 }
  0x66   : > { %p668_p5 = pnand %p667_p0, %p661_p8 }
 0x137   : > { %v248_v4 = vpop.f32.mrb[0].mxu0 }
 0x138   : > { %v254_v5 = vpack.c.bf16 %v248_v4, %v248_v4  ;;  %v503_v6 = vpop.f32.mrb[1].mxu0 }
 0x139   : > { %v251_v7 = vpop.f32.mrb[2].mxu0 }
 0x13a   : > { %255 = vst [vmem:[#allocation2] sm:$0xf] %v254_v5  ;;  %v504_v8 = vpop.f32.mrb[3].mxu0 }
 0x141   : > { %v256_v9 = vld [vmem:[#allocation2] sm:$0xf] }
 0x142   : > { %v257_v10 = vunpack.c.l.bf16 %v256_v9  ;;  %506 = vmatpush3.bf16.xpose.msra.mxu1 %v256_v9  ;;  %v324_v11 = vsel %vm322_vm2, %v256_v9, 0 }
 0x143   : > { %512 = vmatpush3.bf16.msra.mxu0 %v324_v11 }
 0x144   : > { %v258_v12 = vmul.f32 0.17677669, %v257_v10 }
 0x146   : > { %v259_v13 = vpack.c.bf16 %v258_v12, %v258_v12 }
 0x149   : > { %508 = vmatmul.mubr.bf16.vlgmr.msra.gmra.mrb[0].mxu1 %v259_v13 }
 0x21c   : > { %v294_v17 = vpop.f32.mrb[0].mxu1 }
 0x21d   : > { %v305_v18 = vsel %vm304_vm3, %v294_v17, -inf  ;;  %v509_v19 = vpop.f32.mrb[1].mxu1 }
 0x21e   : > { %v297_v20 = vpop.f32.mrb[2].mxu1  ;;  %v307_v21 = vsel %vm306_vm4, %v305_v18, -inf }
 0x21f   : > { %308 = vmax.xlane.f32.xlu0 %v307_v21  ;;  %v510_v22 = vpop.f32.mrb[3].mxu1 }
 0x2ac   : > { %v309_v23 = vpop.xlane.xlu0 %308 }
 0x2ad   : > { %v310_v24 = vsub.f32 %v305_v18, %v309_v23 }
 0x2af   : > { %v311_v25 = vmul.f32 1.442695, %v310_v24 }
 0x2b1   : > { %596 = vpow2.f32 %v311_v25 }
 0x2bb   : > { %v597_v26 = vpop.eup %596 }
 0x2bc   : > { %v313_v27 = vsel %vm306_vm4, %v597_v26, 0.0 }
 0x2bd   : > { %314 = vadd.xlane.f32.xlu0 %v313_v27 }
 0x34a   : > { %v315_v28 = vpop.xlane.xlu0 %314 }
 0x34b   : > { %598 = vrcp.f32 %v315_v28 }
 0x355   : > { %v599_v29 = vpop.eup %598 }
 0x356   : > { %v317_v30 = vmul.f32 %v599_v29, %v597_v26 }
 0x358   : > { %v318_v31 = vpack.c.bf16 %v317_v30, %v317_v30 }
 0x35a   : > { %514 = vmatmul.mubr.msk.bf16.vlgmr.msra.gmra.mrb[4].mxu0 %vm306_vm4, %v318_v31 }
 0x42d   : > { %v360_v32 = vpop.f32.mrb[4].mxu0 }
 0x42e   : > { %366 = vst [vmem:[%s187_s19] sm:$0xff] %v360_v32  ;;  %v515_v33 = vpop.f32.mrb[5].mxu0 }
 0x42f   : > { %v363_v34 = vpop.f32.mrb[6].mxu0 }
 0x430   : > { %671 = shalt.err (!%p668_p5)
}
 0x431   : > { %s672_s29 = scalar_lea.hbm %s939_s7, 128  ;;  %s676_s18 = scalar_lea.hbm %s988_s2, 256 }
 0x432   : > { %p673_p9 = scmp.ne.s32.totalorder %s939_s7, %s672_s29  ;;  %p677_p7 = scmp.lt.u32.totalorder %s939_s7, %s988_s2 }
 0x433   : > { %p678_p3 = scmp.lt.u32.totalorder %s676_s18, %s672_s29  ;;  %p680_p13 = scmp.lt.u32.totalorder %s672_s29, %s939_s7 }
 0x434   : > { %p674_p1 = pnand %p673_p9, %p864_p10 }
 0x435   : > { %p679_p4 = por %p678_p3, %p677_p7 }
 0x436   : > { %p675_p2 = pneg %p674_p1 }
 0x437   : > { %p681_p6 = por %p680_p13, %p679_p4 }
 0x439   : > { %p682_p8 = pnand %p681_p6, %p675_p2 }
 0x43b   : > { %685 = shalt.err (!%p682_p8)
}
 0x43c   : > { %523 = dma.vmem_to_hbm [thread:$0]  (%p864_p10), %s934_s21, 128, %s939_s7, %s368_s24   ;;  %v516_v35 = vpop.f32.mrb[7].mxu0 }
 0x43d PF: > { %s394_s16 = sand.u32 1, %s724_s9   ;;  %p1006_p12 = scmp.ne.s32.totalorder %s996_s20, 0 }
 0x43e   : > { %p1007_p11 = scmp.ge.s32.totalorder %s744_s14, 2  ;;  %s395_s17 = scalar_lea.sflag [#allocation5], %s394_s16 }
 0x440   : > { %p534_p0 = pnand %p1007_p11, %p1006_p12 }
 0x442   : > { %719 = dma.done.wait (!%p534_p0), %s395_s17, 128  }
 0x443   : > { %721 = vsyncadd (!%p534_p0), %s395_s17, 4294967168  ;;  %s19_s14 = sadd.s32 1, %s744_s14   ;;  %s1008_s9 = smov %s728_s10 }
 0x444   : > { %p16_p5 = scmp.ge.s32.totalorder %s19_s14, 4   ;;  %s1009_s10 = smov %s732_s11 }
 0x445   : > { %s1010_s11 = smov %s873_s28  ;;  %s1011_s12 = smov %s740_s13 }
 0x446   : > { %s1012_s13 = smov %s1014_s25  ;;  %18 = sbr.rel (!%p16_p5) target bundleno = 7 (0x7), region = 81 }
 0x44d   :  { %400 = vsyncpa [#allocation4], 1 }
 0x44e   :  { %402 = vsyncpa [#allocation4 + $0x1], 1 }
 0x44f   :  { %403 = vsyncpa [#allocation7], 1 }
 0x450   :  { %404 = vsyncpa [#allocation5], 1 }
 0x451   :  { %406 = vsyncpa [#allocation5 + $0x1], 1 }

</bundles_post_ra>
